<compile_context>
chip_gen: v7x
topology: tpu7x:2x2x1
jax: 0.10.0
libtpu: 0.0.40
codegen_flags: <defaults>
</compile_context>

<pallas_src>
import functools

import jax
import jax.numpy as jnp
from jax.experimental import pallas as pl
from jax.experimental.pallas import tpu as pltpu


# (kernel height k, PyTorch time-padding p) for conv1..conv4, in concat order.
_BRANCHES = ((2, 1), (3, 1), (4, 2), (5, 2))
_MAX_PAD = 2                                  # common pad-2 time frame
_NUM_TAPS = sum(k for k, _ in _BRANCHES)      # 14
_LANE = 128                                   # lane-dense output width


def _round_up(x, m):
    return (x + m - 1) // m * m


def _choose_batch_tile(batch, lp):
    """Batch rows per grid step: TB*Lp ~ 256 MXU rows, TB a multiple of 8
    when the grid has more than one step (keeps the (TB, 128) output block
    and the (TB*Lp, F) input block tile-aligned)."""
    tb = max(8, ((256 // lp) // 8) * 8)
    if batch <= tb:
        return batch            # single grid step; block == full array
    return tb


def _textcnn_kernel(x_ref, wbig_ref, ball_ref, wfc_ref, bfc_ref, out_ref,
                    *, seq_len, num_ch, tb, lp):
    """TB batch rows per grid step.

    x_ref    : (TB*Lp, F)    zero-padded embedded rows (bf16)
    wbig_ref : (F, 14*CH)    all conv taps stacked column-wise (bf16)
    ball_ref : (1, 4*CH)     conv biases, branch order 1..4 (f32)
    wfc_ref  : (4*CH, 128)   fc weight, transposed + lane-padded (bf16)
    bfc_ref  : (1, 128)      fc bias, lane-padded (f32)
    out_ref  : (TB, 128)     lane-dense logits slab (f32)
    """
    # One wide MXU push covering every tap of every branch for all TB rows.
    proj = jnp.dot(x_ref[...], wbig_ref[...],
                   preferred_element_type=jnp.float32)       # (TB*Lp, 14*CH)
    proj = proj.reshape(tb, lp, -1)                          # 8-aligned split

    pools = []
    col = 0
    for k, pad in _BRANCHES:                   # static, fully unrolled
        off = _MAX_PAD - pad                   # offset into the pad-2 frame
        n = seq_len + 2 * pad - k + 1          # conv output length
        acc = proj[:, off:off + n, col:col + num_ch]
        col += num_ch
        for dk in range(1, k):
            acc = acc + proj[:, off + dk:off + dk + n, col:col + num_ch]
            col += num_ch
        # Max over time; bias & LeakyReLU commute with the max (bias constant
        # over t, LeakyReLU monotone increasing).
        pools.append(jnp.max(acc, axis=1))                   # (TB, CH)

    pooled = jnp.concatenate(pools, axis=1) + ball_ref[...]  # (TB, 4*CH)
    pooled = jnp.where(pooled >= 0.0, pooled, 0.01 * pooled)  # LeakyReLU
    logits = jnp.dot(pooled.astype(jnp.bfloat16), wfc_ref[...],
                     preferred_element_type=jnp.float32) + bfc_ref[...]
    out_ref[...] = logits                                    # (TB, 128)


def prepare_params(emb_table, conv_weights, conv_biases, w_fc, b_fc):
    """One-time parameter packing (kept out of the per-call forward path)."""
    cols = []
    for (k, _), w in zip(_BRANCHES, conv_weights):           # w: (CH, k, F)
        for dk in range(k):
            cols.append(jnp.transpose(w[:, dk, :]))          # (F, CH)
    w_big = jnp.concatenate(cols, axis=1).astype(jnp.bfloat16)   # (F, 14*CH)
    b_all = jnp.concatenate(conv_biases).reshape(1, -1).astype(jnp.float32)

    c = w_fc.shape[0]
    wfc_t = jnp.zeros((w_fc.shape[1], _LANE), jnp.float32)
    wfc_t = wfc_t.at[:, :c].set(jnp.transpose(w_fc)).astype(jnp.bfloat16)
    bfc = jnp.zeros((1, _LANE), jnp.float32).at[0, :c].set(b_fc)

    emb_bf16 = emb_table.astype(jnp.bfloat16)
    return emb_bf16, w_big, b_all, wfc_t, bfc


def custom_cnn_classifier_forward(tokens, emb_bf16, w_big, b_all, wfc_t, bfc,
                                  num_classes):
    """Forward pass: bf16 embedding gather + zero-pad are JAX glue; convs,
    pools, activation and fc run inside one batch-blocked Pallas kernel."""
    B, L = tokens.shape
    F = emb_bf16.shape[1]
    CH = b_all.shape[1] // 4
    Lp = _round_up(L + 2 * _MAX_PAD, 8)
    TB = _choose_batch_tile(B, Lp)
    n_blocks = pl.cdiv(B, TB)
    B_pad = n_blocks * TB

    # Single bf16 gather + zero-pad pass (extra rows are zero and never read
    # by the in-kernel tap slices; they only pad the matmul M dimension).
    emb = jnp.take(emb_bf16, tokens, axis=0)                     # (B, L, F)
    x = jnp.pad(emb, ((0, B_pad - B),
                      (_MAX_PAD, Lp - L - _MAX_PAD),
                      (0, 0)))                                   # (B_pad, Lp, F)
    x2 = x.reshape(B_pad * Lp, F)                                # matmul LHS slab

    kern = functools.partial(_textcnn_kernel, seq_len=L, num_ch=CH,
                             tb=TB, lp=Lp)
    flops = (2 * B_pad * Lp * F * _NUM_TAPS * CH
             + 2 * B_pad * 4 * CH * _LANE)
    bytes_accessed = (x2.size * 2 + w_big.size * 2 + b_all.size * 4
                      + wfc_t.size * 2 + bfc.size * 4 + B_pad * _LANE * 4)

    out = pl.pallas_call(
        kern,
        out_shape=jax.ShapeDtypeStruct((B_pad, _LANE), jnp.float32),
        grid=(n_blocks,),
        in_specs=[
            pl.BlockSpec((TB * Lp, F), lambda b: (b, 0)),
            pl.BlockSpec(w_big.shape, lambda b: (0, 0)),
            pl.BlockSpec(b_all.shape, lambda b: (0, 0)),
            pl.BlockSpec(wfc_t.shape, lambda b: (0, 0)),
            pl.BlockSpec(bfc.shape, lambda b: (0, 0)),
        ],
        out_specs=pl.BlockSpec((TB, _LANE), lambda b: (b, 0)),
        compiler_params=pltpu.CompilerParams(
            dimension_semantics=("parallel",)),
        cost_estimate=pl.CostEstimate(flops=flops, transcendentals=0,
                                      bytes_accessed=bytes_accessed),
    )(x2, w_big, b_all, wfc_t, bfc)
    return out[:B, :num_classes]


def _reference_forward(tokens, emb_table, conv_ws, conv_bs, w_fc, b_fc):
    """Pure-JAX f32 reference of the PyTorch module (eval mode)."""
    B, L = tokens.shape
    emb = jnp.take(emb_table, tokens, axis=0)                    # (B, L, F)
    pools = []
    for (k, pad), w, b in zip(_BRANCHES, conv_ws, conv_bs):
        xp = jnp.pad(emb, ((0, 0), (pad, pad), (0, 0)))
        n = L + 2 * pad - k + 1
        conv = jnp.zeros((B, n, w.shape[0]), jnp.float32)
        for dk in range(k):
            conv = conv + jnp.einsum('blf,cf->blc',
                                     xp[:, dk:dk + n, :], w[:, dk, :])
        conv = conv + b[None, None, :]
        conv = jnp.where(conv >= 0.0, conv, 0.01 * conv)         # LeakyReLU
        pools.append(jnp.max(conv, axis=1))                      # (B, CH)
    pooled = jnp.concatenate(pools, axis=1)
    return pooled @ w_fc.T + b_fc[None, :]


if __name__ == "__main__":
    # Module hyperparameters (small, consistent with the forward pass).
    feature_length = 32     # embedding dim F
    word_length = 64        # vocab size
    longest = 16            # conv out-channels (== sequence length here)
    type_num = 5
    B, L = 2, 16            # batch, sequence length

    key = jax.random.PRNGKey(0)
    keys = jax.random.split(key, 12)

    # Embedding: xavier_normal_ on (word_length, feature_length).
    xav_std = (2.0 / (word_length + feature_length)) ** 0.5
    emb_table = jax.random.normal(keys[0], (word_length, feature_length),
                                  jnp.float32) * xav_std

    # Conv2d(1, longest, (k, F)): in-channel dim of 1 squeezed -> (longest, k, F).
    conv_ws, conv_bs = [], []
    for i, (k, _) in enumerate(_BRANCHES):
        fan_in = k * feature_length
        bound = 1.0 / (fan_in ** 0.5)
        conv_ws.append(jax.random.uniform(
            keys[1 + 2 * i], (longest, k, feature_length),
            jnp.float32, -bound, bound))
        conv_bs.append(jax.random.uniform(
            keys[2 + 2 * i], (longest,), jnp.float32, -bound, bound))

    # fc: Linear(4*longest, type_num).
    kf = 1.0 / ((4 * longest) ** 0.5)
    w_fc = jax.random.uniform(keys[9], (type_num, 4 * longest),
                              jnp.float32, -kf, kf)
    b_fc = jax.random.uniform(keys[10], (type_num,), jnp.float32, -kf, kf)

    # Integer token input, shape (B, longest).
    tokens = jax.random.randint(keys[11], (B, L), 0, word_length, jnp.int32)

    params = prepare_params(emb_table, conv_ws, conv_bs, w_fc, b_fc)
    forward = jax.jit(custom_cnn_classifier_forward, static_argnums=(6,))
    logits = forward(tokens, *params, type_num)
    jax.block_until_ready(logits)
    assert logits.shape == (B, type_num)

    ref = _reference_forward(tokens, emb_table, conv_ws, conv_bs, w_fc, b_fc)
    assert jnp.allclose(logits, ref, atol=5e-2), (
        "max abs err vs reference: "
        f"{float(jnp.max(jnp.abs(logits - ref)))}")
    print("KERNEL_OK")
</pallas_src>

<mosaic_0001>
module attributes {stable_mosaic.version = 11 : i64} {
  func.func @_textcnn_kernel(%arg0: i32, %arg1: memref<48x32xbf16, #tpu.memory_space<vmem>>, %arg2: memref<32x224xbf16, #tpu.memory_space<vmem>>, %arg3: memref<1x64xf32, #tpu.memory_space<vmem>>, %arg4: memref<64x128xbf16, #tpu.memory_space<vmem>>, %arg5: memref<1x128xf32, #tpu.memory_space<vmem>>, %arg6: memref<2x128xf32, #tpu.memory_space<vmem>>) attributes {dimension_semantics = [#tpu.dimension_semantics<parallel>], iteration_bounds = array<i64: 1>, scalar_prefetch = 0 : i64, scratch_operands = 0 : i64, tpu.core_type = #tpu.core_type<tc>, window_params = [{transform_indices = @transform_0, window_bounds = array<i64: 48, 32>}, {pipeline_mode = #tpu.pipeline_mode<synchronous>, transform_indices = @transform_1, window_bounds = array<i64: 32, 224>}, {pipeline_mode = #tpu.pipeline_mode<synchronous>, transform_indices = @transform_2, window_bounds = array<i64: 1, 64>}, {pipeline_mode = #tpu.pipeline_mode<synchronous>, transform_indices = @transform_3, window_bounds = array<i64: 64, 128>}, {pipeline_mode = #tpu.pipeline_mode<synchronous>, transform_indices = @transform_4, window_bounds = array<i64: 1, 128>}, {transform_indices = @transform_5, window_bounds = array<i64: 2, 128>}]} {
    %c0 = arith.constant 0 : index
    %c0_0 = arith.constant 0 : index
    %0 = vector.load %arg1[%c0, %c0_0] : memref<48x32xbf16, #tpu.memory_space<vmem>>, vector<48x32xbf16>
    %c0_1 = arith.constant 0 : index
    %c0_2 = arith.constant 0 : index
    %1 = vector.load %arg2[%c0_1, %c0_2] : memref<32x224xbf16, #tpu.memory_space<vmem>>, vector<32x224xbf16>
    %cst = arith.constant dense<0.000000e+00> : vector<48x224xf32>
    %2 = tpu.matmul %0, %1, %cst {dimension_numbers = #tpu.dot_dimension_numbers<[1], [0], [0], [1], [0, 0, 1, 1], [], []>} : vector<48x32xbf16>, vector<32x224xbf16>, vector<48x224xf32> -> vector<48x224xf32>
    %3 = vector.shape_cast %2 : vector<48x224xf32> to vector<2x24x224xf32>
    %4 = vector.extract_strided_slice %3 {offsets = [0, 1, 0], sizes = [2, 17, 16], strides = [1, 1, 1]} : vector<2x24x224xf32> to vector<2x17x16xf32>
    %5 = vector.extract_strided_slice %3 {offsets = [0, 2, 16], sizes = [2, 17, 16], strides = [1, 1, 1]} : vector<2x24x224xf32> to vector<2x17x16xf32>
    %6 = arith.addf %4, %5 : vector<2x17x16xf32>
    %cst_3 = arith.constant dense<0xFF800000> : vector<2x16xf32>
    %7 = vector.multi_reduction <maximumf>, %6, %cst_3 [1] : vector<2x17x16xf32> to vector<2x16xf32>
    %8 = vector.extract_strided_slice %3 {offsets = [0, 1, 32], sizes = [2, 16, 16], strides = [1, 1, 1]} : vector<2x24x224xf32> to vector<2x16x16xf32>
    %9 = vector.extract_strided_slice %3 {offsets = [0, 2, 48], sizes = [2, 16, 16], strides = [1, 1, 1]} : vector<2x24x224xf32> to vector<2x16x16xf32>
    %10 = arith.addf %8, %9 : vector<2x16x16xf32>
    %11 = vector.extract_strided_slice %3 {offsets = [0, 3, 64], sizes = [2, 16, 16], strides = [1, 1, 1]} : vector<2x24x224xf32> to vector<2x16x16xf32>
    %12 = arith.addf %10, %11 : vector<2x16x16xf32>
    %cst_4 = arith.constant dense<0xFF800000> : vector<2x16xf32>
    %13 = vector.multi_reduction <maximumf>, %12, %cst_4 [1] : vector<2x16x16xf32> to vector<2x16xf32>
    %14 = vector.extract_strided_slice %3 {offsets = [0, 0, 80], sizes = [2, 17, 16], strides = [1, 1, 1]} : vector<2x24x224xf32> to vector<2x17x16xf32>
    %15 = vector.extract_strided_slice %3 {offsets = [0, 1, 96], sizes = [2, 17, 16], strides = [1, 1, 1]} : vector<2x24x224xf32> to vector<2x17x16xf32>
    %16 = arith.addf %14, %15 : vector<2x17x16xf32>
    %17 = vector.extract_strided_slice %3 {offsets = [0, 2, 112], sizes = [2, 17, 16], strides = [1, 1, 1]} : vector<2x24x224xf32> to vector<2x17x16xf32>
    %18 = arith.addf %16, %17 : vector<2x17x16xf32>
    %19 = vector.extract_strided_slice %3 {offsets = [0, 3, 128], sizes = [2, 17, 16], strides = [1, 1, 1]} : vector<2x24x224xf32> to vector<2x17x16xf32>
    %20 = arith.addf %18, %19 : vector<2x17x16xf32>
    %cst_5 = arith.constant dense<0xFF800000> : vector<2x16xf32>
    %21 = vector.multi_reduction <maximumf>, %20, %cst_5 [1] : vector<2x17x16xf32> to vector<2x16xf32>
    %22 = vector.extract_strided_slice %3 {offsets = [0, 0, 144], sizes = [2, 16, 16], strides = [1, 1, 1]} : vector<2x24x224xf32> to vector<2x16x16xf32>
    %23 = vector.extract_strided_slice %3 {offsets = [0, 1, 160], sizes = [2, 16, 16], strides = [1, 1, 1]} : vector<2x24x224xf32> to vector<2x16x16xf32>
    %24 = arith.addf %22, %23 : vector<2x16x16xf32>
    %25 = vector.extract_strided_slice %3 {offsets = [0, 2, 176], sizes = [2, 16, 16], strides = [1, 1, 1]} : vector<2x24x224xf32> to vector<2x16x16xf32>
    %26 = arith.addf %24, %25 : vector<2x16x16xf32>
    %27 = vector.extract_strided_slice %3 {offsets = [0, 3, 192], sizes = [2, 16, 16], strides = [1, 1, 1]} : vector<2x24x224xf32> to vector<2x16x16xf32>
    %28 = arith.addf %26, %27 : vector<2x16x16xf32>
    %29 = vector.extract_strided_slice %3 {offsets = [0, 4, 208], sizes = [2, 16, 16], strides = [1, 1, 1]} : vector<2x24x224xf32> to vector<2x16x16xf32>
    %30 = arith.addf %28, %29 : vector<2x16x16xf32>
    %cst_6 = arith.constant dense<0xFF800000> : vector<2x16xf32>
    %31 = vector.multi_reduction <maximumf>, %30, %cst_6 [1] : vector<2x16x16xf32> to vector<2x16xf32>
    %32 = tpu.concatenate %7, %13, %21, %31 in 1 : vector<2x16xf32>, vector<2x16xf32>, vector<2x16xf32>, vector<2x16xf32> -> vector<2x64xf32>
    %c0_7 = arith.constant 0 : index
    %c0_8 = arith.constant 0 : index
    %33 = vector.load %arg3[%c0_7, %c0_8] : memref<1x64xf32, #tpu.memory_space<vmem>>, vector<1x64xf32>
    %34 = vector.broadcast %33 : vector<1x64xf32> to vector<2x64xf32>
    %35 = arith.addf %32, %34 : vector<2x64xf32>
    %cst_9 = arith.constant 0.000000e+00 : f32
    %36 = vector.broadcast %cst_9 : f32 to vector<2x64xf32>
    %37 = arith.cmpf oge, %35, %36 : vector<2x64xf32>
    %cst_10 = arith.constant 0.00999999977 : f32
    %38 = vector.broadcast %cst_10 : f32 to vector<2x64xf32>
    %39 = arith.mulf %38, %35 : vector<2x64xf32>
    %40 = arith.select %37, %35, %39 : vector<2x64xi1>, vector<2x64xf32>
    %41 = arith.truncf %40 : vector<2x64xf32> to vector<2x64xbf16>
    %c0_11 = arith.constant 0 : index
    %c0_12 = arith.constant 0 : index
    %42 = vector.load %arg4[%c0_11, %c0_12] : memref<64x128xbf16, #tpu.memory_space<vmem>>, vector<64x128xbf16>
    %cst_13 = arith.constant dense<0.000000e+00> : vector<2x128xf32>
    %43 = tpu.matmul %41, %42, %cst_13 {dimension_numbers = #tpu.dot_dimension_numbers<[1], [0], [0], [1], [0, 0, 1, 1], [], []>} : vector<2x64xbf16>, vector<64x128xbf16>, vector<2x128xf32> -> vector<2x128xf32>
    %c0_14 = arith.constant 0 : index
    %c0_15 = arith.constant 0 : index
    %44 = vector.load %arg5[%c0_14, %c0_15] : memref<1x128xf32, #tpu.memory_space<vmem>>, vector<1x128xf32>
    %45 = vector.broadcast %44 : vector<1x128xf32> to vector<2x128xf32>
    %46 = arith.addf %43, %45 : vector<2x128xf32>
    %c0_16 = arith.constant 0 : index
    %c0_17 = arith.constant 0 : index
    %47 = vector.load %arg6[%c0_16, %c0_17] : memref<2x128xf32, #tpu.memory_space<vmem>>, vector<2x128xf32>
    tpu.vector_store %arg6[%c0_16, %c0_17], %46 {strides = array<i32>} : memref<2x128xf32, #tpu.memory_space<vmem>>, vector<2x128xf32>,
    return
  }
  func.func @transform_0(%arg0: i32) -> (i32, i32) {
    %c0_i32 = arith.constant 0 : i32
    %c0_i32_0 = arith.constant 0 : i32
    return %arg0, %c0_i32 : i32, i32
  }
  func.func @transform_1(%arg0: i32) -> (i32, i32) {
    %c0_i32 = arith.constant 0 : i32
    %c0_i32_0 = arith.constant 0 : i32
    %c0_i32_1 = arith.constant 0 : i32
    return %c0_i32, %c0_i32_0 : i32, i32
  }
  func.func @transform_2(%arg0: i32) -> (i32, i32) {
    %c0_i32 = arith.constant 0 : i32
    %c0_i32_0 = arith.constant 0 : i32
    %c0_i32_1 = arith.constant 0 : i32
    return %c0_i32, %c0_i32_0 : i32, i32
  }
  func.func @transform_3(%arg0: i32) -> (i32, i32) {
    %c0_i32 = arith.constant 0 : i32
    %c0_i32_0 = arith.constant 0 : i32
    %c0_i32_1 = arith.constant 0 : i32
    return %c0_i32, %c0_i32_0 : i32, i32
  }
  func.func @transform_4(%arg0: i32) -> (i32, i32) {
    %c0_i32 = arith.constant 0 : i32
    %c0_i32_0 = arith.constant 0 : i32
    %c0_i32_1 = arith.constant 0 : i32
    return %c0_i32, %c0_i32_0 : i32, i32
  }
  func.func @transform_5(%arg0: i32) -> (i32, i32) {
    %c0_i32 = arith.constant 0 : i32
    %c0_i32_0 = arith.constant 0 : i32
    return %arg0, %c0_i32 : i32, i32
  }
}

</mosaic_0001>

<bundles_post_ra>
// kernel: custom_cnn_classifier_forward.1
= control target key start
LH: loop header
LB: loop body
LE: loop exit
PB: predicated region body
PF: predicated region fallthrough
CT: control target
= control target key end

     0   :  { %v650_v2 = vmov 0   ;;  %vm67_vm0 = vcmask 261120   ;;  %s889_s0 = inlined_call_operand.vmem [shape: bf16[48,32], index: 0, kind: input, shape index: {}]   ;;  %s890_s1 = inlined_call_operand.vmem [shape: bf16[32,224], index: 1, kind: input, shape index: {}]   ;;  %s891_s2 = inlined_call_operand.vmem [shape: f32[1,64], index: 2, kind: input, shape index: {}]   ;;  %s892_s3 = inlined_call_operand.vmem [shape: bf16[64,128], index: 3, kind: input, shape index: {}]   ;;  %s893_s4 = inlined_call_operand.vmem [shape: f32[1,128], index: 4, kind: input, shape index: {}]   ;;  %s894_s5 = inlined_call_operand.hbm [shape: f32[2,128], index: 5, kind: output, shape index: {}]  }
   0x1   :  { %v613_v0 = vld [vmem:[%s890_s1 + $0x4] ss:$8 sps:$4 sm:$0xff]   ;;  %v615_v1 = vld [vmem:[%s890_s1] ss:$8 sps:$4 sm:$0xff]   ;;  %109 = vmatprep.mubr.bf16.mxu0 %v650_v2  ;;  %v616_v3 = vld [vmem:[%s890_s1 + $0x14] ss:$8 sps:$4 sm:$0xff]  }
   0x2   :  { %77 = vmatprep.subr.bf16.mxu0 %v613_v0  ;;  %v618_v4 = vld [vmem:[%s890_s1 + $0x10] ss:$8 sps:$4 sm:$0xff]   ;;  %v619_v5 = vld [vmem:[%s889_s0] sm:$0xff]  }
   0x3   :  { %78 = vmatpush1.bf16.msra.mxu0 %v615_v1 }
   0x4   :  { %79 = vmatprep.subr.bf16.mxu0 %v616_v3 }
   0x7   :  { %80 = vmatpush1.bf16.msra.mxu0 %v618_v4 }
   0x8   :  { %10 = vsyncpa [#allocation3], 0  ;;  %v620_v6 = vld [vmem:[%s889_s0 + $0x8] sm:$0xff]   ;;  %v621_v7 = vld [vmem:[%s889_s0 + $0x10] sm:$0xff]   ;;  %vm146_vm1 = vcmask 1046528   ;;  %vm206_vm2 = vcmask 1045504  }
   0x9   :  { %vm272_vm3 = vcmask 1044480   ;;  %vm387_vm4 = vcmask 1043456   ;;  %s651_s0 = smov 112   ;;  %s652_s6 = smov 96   ;;  %vm181_vm5 = vcmask 130049   ;;  %vm185_vm6 = vcmask 123904  }
   0xa   :  { %577 = vmatmul.mubr.msk.bf16.vlgmr.msra.gmra.mrb[0].mxu0 %vm67_vm0, %v619_v5  ;;  %s653_s7 = smov 80   ;;  %s654_s8 = smov 64   ;;  %vm241_vm7 = vcmask 392449   ;;  %vm307_vm8 = vcmask 786048   ;;  %vm183_vm9 = vcmask 130048   ;;  %vm245_vm10 = vcmask 385280  }
   0xb   :  { %119 = vmatprep.mubr.bf16.mxu0 %v650_v2  ;;  %vm310_vm11 = vcmask 778880   ;;  %vm243_vm12 = vcmask 392448   ;;  %vm414_vm13 = vcmask 261248   ;;  %vm435_vm14 = vcmask 1041409   ;;  %s657_s17 = smov 32   ;;  %s658_s21 = smov [#allocation2]  }
   0xc   :  { %vm656_vm15 = vmmov 0   ;;  %s562_s22 = sshll.u32 %s658_s21, 4  ;;  %s563_s22 = int_to_ptr.vmem [resolvable:$true] %s562_s22 }
   0xd   :  { %p631_p1 = scmp.lt.s32.totalorder %s563_s22, %s563_s22 }
  0x12   :  { %578 = vmatmul.mubr.msk.bf16.gmra.mrb[4].mxu0 %vm67_vm0, %v620_v6 }
  0x13   :  { %129 = vmatprep.mubr.bf16.mxu0 %v650_v2 }
  0x1a   :  { %579 = vmatmul.mubr.msk.bf16.gmra.mrb[8].mxu0 %vm67_vm0, %v621_v7 }
  0xdd   :  { %v713_v8 = vpop.f32.mrb[0].mxu0 }
  0xde   :  { %v715_v9 = vpop.f32.mrb[1].mxu0  ;;  %v147_v10 = vrot.slane %v713_v8, 1  ;;  %v207_v11 = vrot.slane %v713_v8, 2 }
  0xdf   :  { %v719_v12 = vpop.f32.mrb[2].mxu0  ;;  %v331_v13 = vrot.slane %v715_v9, 1  ;;  %v357_v14 = vrot.slane %v715_v9, 2  ;;  %v273_v18 = vrot.slane %v715_v9, 3  ;;  %v388_v19 = vrot.slane %v715_v9, 4 }
  0xe0   :  { %v148_v15 = vrot.slane %v719_v12, 1  ;;  %v208_v16 = vrot.slane %v719_v12, 2  ;;  %v725_v17 = vpop.f32.mrb[3].mxu0 }
  0xe1   :  { %v332_v20 = vrot.slane %v725_v17, 1  ;;  %v358_v21 = vrot.slane %v725_v17, 2  ;;  %v274_v22 = vrot.slane %v725_v17, 3  ;;  %v389_v23 = vrot.slane %v725_v17, 4 }
  0xe2   :  { %v149_v24 = vsel %vm146_vm1, %v147_v10, %v148_v15  ;;  %v209_v25 = vsel %vm206_vm2, %v207_v11, %v208_v16 }
  0xe3   :  { %157 = vrot.lane.b32.xlu0 %v149_v24, %s651_s0  ;;  %v333_v26 = vsel %vm146_vm1, %v331_v13, %v332_v20  ;;  %v359_v27 = vsel %vm206_vm2, %v357_v14, %v358_v21  ;;  %v275_v28 = vsel %vm272_vm3, %v273_v18, %v274_v22  ;;  %v390_v29 = vsel %vm387_vm4, %v388_v19, %v389_v23 }
  0xe5   :  { %v740_v30 = vpop.f32.mrb[4].mxu0 }
  0xe6   :  { %v150_v31 = vrot.slane %v740_v30, 1  ;;  %v123_v32 = vpop.f32.mrb[5].mxu0  ;;  %v210_v33 = vrot.slane %v740_v30, 2 }
  0xe7   :  { %v334_v34 = vrot.slane %v123_v32, 1  ;;  %v360_v35 = vrot.slane %v123_v32, 2  ;;  %v391_v36 = vrot.slane %v123_v32, 4  ;;  %217 = vrot.lane.b32.xlu0 %v209_v25, %s652_s6  ;;  %v745_v37 = vpop.f32.mrb[6].mxu0  ;;  %v276_v38 = vrot.slane %v123_v32, 3 }
  0xe8   :  { %221 = vrot.lane.b32.xlu1 %v210_v33, %s652_s6  ;;  %v748_v39 = vpop.f32.mrb[7].mxu0  ;;  %v151_v40 = vsel %vm146_vm1, %v148_v15, %v150_v31  ;;  %v211_v41 = vsel %vm206_vm2, %v208_v16, %v210_v33  ;;  %v152_v46 = vrot.slane %v745_v37, 1  ;;  %v212_v47 = vrot.slane %v745_v37, 2 }
  0xe9   :  { %v335_v42 = vsel %vm146_vm1, %v332_v20, %v334_v34  ;;  %v361_v43 = vsel %vm206_vm2, %v358_v21, %v360_v35  ;;  %v392_v44 = vsel %vm387_vm4, %v389_v23, %v391_v36  ;;  %v277_v45 = vsel %vm272_vm3, %v274_v22, %v276_v38 }
  0xea   :  { %v336_v49 = vrot.slane %v748_v39, 1  ;;  %v362_v50 = vrot.slane %v748_v39, 2  ;;  %v278_v54 = vrot.slane %v748_v39, 3  ;;  %v393_v55 = vrot.slane %v748_v39, 4 }
  0xeb   :  { %341 = vrot.lane.b32.xlu0 %v333_v26, %s651_s0 }
  0xec   :  { %287 = vrot.lane.b32.xlu1 %v276_v38, %s653_s7 }
  0xed   :  { %v760_v48 = vpop.f32.mrb[8].mxu0 }
  0xee   :  { %v153_v51 = vrot.slane %v760_v48, 1  ;;  %v213_v52 = vrot.slane %v760_v48, 2  ;;  %v766_v53 = vpop.f32.mrb[9].mxu0 }
  0xef   :  { %367 = vrot.lane.b32.xlu0 %v359_v27, %s652_s6  ;;  %v771_v56 = vpop.f32.mrb[10].mxu0  ;;  %v337_v57 = vrot.slane %v766_v53, 1  ;;  %v363_v58 = vrot.slane %v766_v53, 2  ;;  %v279_v59 = vrot.slane %v766_v53, 3  ;;  %v394_v60 = vrot.slane %v766_v53, 4 }
  0xf0   :  { %343 = vrot.lane.b32.xlu1 %v335_v42, %s651_s0  ;;  %v155_v61 = vrot.slane %v771_v56, 1  ;;  %v215_v62 = vrot.slane %v771_v56, 2  ;;  %v137_v63 = vpop.f32.mrb[11].mxu0  ;;  %v154_v0 = vsel %vm146_vm1, %v152_v46, %v153_v51  ;;  %v214_v1 = vsel %vm206_vm2, %v212_v47, %v213_v52 }
  0xf1   :  { %v281_v2 = vrot.slane %v137_v63, 3  ;;  %v339_v3 = vrot.slane %v137_v63, 1  ;;  %v365_v4 = vrot.slane %v137_v63, 2  ;;  %v396_v5 = vrot.slane %v137_v63, 4 }
  0xf2   :  { %v156_v6 = vsel %vm146_vm1, %v153_v51, %v155_v61  ;;  %v216_v7 = vsel %vm206_vm2, %v213_v52, %v215_v62  ;;  %v338_v10 = vsel %vm146_vm1, %v336_v49, %v337_v57  ;;  %v364_v11 = vsel %vm206_vm2, %v362_v50, %v363_v58 }
  0xf3   :  { %283 = vrot.lane.b32.xlu0 %v275_v28, %s653_s7  ;;  %v340_v13 = vsel %vm146_vm1, %v337_v57, %v339_v3  ;;  %v280_v14 = vsel %vm272_vm3, %v278_v54, %v279_v59  ;;  %v366_v15 = vsel %vm206_vm2, %v363_v58, %v365_v4  ;;  %v395_v16 = vsel %vm387_vm4, %v393_v55, %v394_v60 }
  0xf4   :  { %369 = vrot.lane.b32.xlu1 %v361_v43, %s652_s6  ;;  %v282_v18 = vsel %vm272_vm3, %v279_v59, %v281_v2  ;;  %v397_v19 = vsel %vm387_vm4, %v394_v60, %v396_v5  ;;  %vm458_vm1 = vcmask 392192   ;;  %vm511_vm3 = vcmask 523264  }
  0xf7   :  { %398 = vrot.lane.b32.xlu0 %v390_v29, %s654_s8 }
  0xf8   :  { %400 = vrot.lane.b32.xlu1 %v392_v44, %s654_s8 }
  0xfb   :  { %161 = vrot.lane.b32.xlu0 %v150_v31, %s651_s0 }
  0xfc   :  { %163 = vrot.lane.b32.xlu1 %v154_v0, %s651_s0 }
  0xff   :  { %159 = vrot.lane.b32.xlu0 %v151_v40, %s651_s0 }
 0x100   :  { %167 = vrot.lane.b32.xlu1 %v155_v61, %s651_s0 }
 0x103   :  { %219 = vrot.lane.b32.xlu0 %v211_v41, %s652_s6 }
 0x104   :  { %227 = vrot.lane.b32.xlu1 %v215_v62, %s652_s6 }
 0x107   :  { %285 = vrot.lane.b32.xlu0 %v277_v45, %s653_s7 }
 0x108   :  { %165 = vrot.lane.b32.xlu1 %v156_v6, %s651_s0 }
 0x10b   :  { %223 = vrot.lane.b32.xlu0 %v214_v1, %s652_s6 }
 0x10c   :  { %225 = vrot.lane.b32.xlu1 %v216_v7, %s652_s6 }
 0x10f   :  { %345 = vrot.lane.b32.xlu0 %v338_v10, %s651_s0 }
 0x110   :  { %293 = vrot.lane.b32.xlu1 %v281_v2, %s653_s7 }
 0x113   :  { %371 = vrot.lane.b32.xlu0 %v364_v11, %s652_s6 }
 0x114   :  { %347 = vrot.lane.b32.xlu1 %v340_v13, %s651_s0 }
 0x117   :  { %289 = vrot.lane.b32.xlu0 %v280_v14, %s653_s7 }
 0x118   :  { %373 = vrot.lane.b32.xlu1 %v366_v15, %s652_s6 }
 0x11b   :  { %402 = vrot.lane.b32.xlu0 %v395_v16, %s654_s8 }
 0x11c   :  { %291 = vrot.lane.b32.xlu1 %v282_v18, %s653_s7 }
 0x120   :  { %404 = vrot.lane.b32.xlu1 %v397_v19, %s654_s8 }
 0x155   :  { %v158_v20 = vpop.permute.xlu0 %157 }
 0x156   :  { %v175_v32 = vadd.f32 %v158_v20, %v713_v8 }
 0x158   :  { %v182_v38 = vsel %vm181_vm5, %v175_v32, -inf }
 0x159   :  { %v218_v21 = vpop.permute.xlu0 %217 }
 0x15a   :  { %v222_v22 = vpop.permute.xlu1 %221  ;;  %v235_v33 = vadd.f32 %v218_v21, %v175_v32 }
 0x15c   :  { %v242_v43 = vsel %vm241_vm7, %v235_v33, -inf }
 0x15d   :  { %v342_v23 = vpop.permute.xlu0 %341 }
 0x15e   :  { %v288_v24 = vpop.permute.xlu1 %287  ;;  %v353_v46 = vadd.f32 %v342_v23, %v715_v9 }
 0x161   :  { %v368_v25 = vpop.permute.xlu0 %367 }
 0x162   :  { %v344_v26 = vpop.permute.xlu1 %343  ;;  %v379_v54 = vadd.f32 %v368_v25, %v353_v46  ;;  %v622_v46 = vld [vmem:[%s892_s3] sm:$0xff]  }
 0x163   :  { %v354_v61 = vadd.f32 %v344_v26, %v725_v17 }
 0x165   :  { %v284_v27 = vpop.permute.xlu0 %283 }
 0x166   :  { %v370_v28 = vpop.permute.xlu1 %369  ;;  %v301_v40 = vadd.f32 %v284_v27, %v235_v33  ;;  %v383_v0 = vadd.f32 %v379_v54, %v284_v27 }
 0x167   :  { %v380_v2 = vadd.f32 %v370_v28, %v354_v61 }
 0x168   :  { %v308_v55 = vsel %vm307_vm8, %v301_v40, -inf }
 0x169   :  { %v399_v29 = vpop.permute.xlu0 %398 }
 0x16a   :  { %v401_v31 = vpop.permute.xlu1 %400  ;;  %v410_v4 = vadd.f32 %v399_v29, %v383_v0 }
 0x16c   :  { %v415_v19 = vsel %vm414_vm13, %v410_v4, -inf }
 0x16d   :  { %v162_v34 = vpop.permute.xlu0 %161 }
 0x16e   :  { %v177_v35 = vadd.f32 %v162_v34, %v740_v30  ;;  %v164_v36 = vpop.permute.xlu1 %163 }
 0x16f   :  { %v178_v44 = vadd.f32 %v164_v36, %v745_v37 }
 0x170   :  { %v186_v41 = vsel %vm185_vm6, %v177_v35, -inf  ;;  %v237_v42 = vadd.f32 %v222_v22, %v177_v35 }
 0x171   :  { %v187_v8 = vmax.f32 %v182_v38, %v186_v41  ;;  %v160_v45 = vpop.permute.xlu0 %159  ;;  %v195_v58 = vsel %vm181_vm5, %v178_v44, -inf }
 0x172   :  { %v303_v30 = vadd.f32 %v288_v24, %v237_v42  ;;  %v176_v47 = vadd.f32 %v160_v45, %v719_v12  ;;  %v168_v49 = vpop.permute.xlu1 %167  ;;  %v246_v50 = vsel %vm245_vm10, %v237_v42, -inf }
 0x173   :  { %v180_v51 = vadd.f32 %v168_v49, %v771_v56  ;;  %v247_v52 = vmax.f32 %v242_v43, %v246_v50 }
 0x174   :  { %v184_v57 = vsel %vm183_vm9, %v176_v47, -inf  ;;  %v311_v37 = vsel %vm310_vm11, %v303_v30, -inf }
 0x175   :  { %v188_v9 = vmax.f32 %v187_v8, %v184_v57  ;;  %v197_v59 = vsel %vm185_vm6, %v180_v51, -inf  ;;  %v220_v12 = vpop.permute.xlu0 %219  ;;  %v312_v60 = vmax.f32 %v308_v55, %v311_v37 }
 0x176   :  { %v198_v62 = vmax.f32 %v195_v58, %v197_v59  ;;  %v236_v56 = vadd.f32 %v220_v12, %v176_v47  ;;  %v228_v63 = vpop.permute.xlu1 %227 }
 0x177   :  { %v189_v1 = vrot.slane %v188_v9, 4  ;;  %v240_v17 = vadd.f32 %v228_v63, %v180_v51 }
 0x178   :  { %v244_v3 = vsel %vm243_vm12, %v236_v56, -inf }
 0x179   :  { %v190_v5 = vmax.f32 %v188_v9, %v189_v1  ;;  %v248_v6 = vmax.f32 %v247_v52, %v244_v3  ;;  %v286_v7 = vpop.permute.xlu0 %285  ;;  %v655_v52 = vmov 0.0  }
 0x17a   :  { %v302_v10 = vadd.f32 %v286_v7, %v236_v56  ;;  %v384_v11 = vadd.f32 %v380_v2, %v286_v7  ;;  %v166_v13 = vpop.permute.xlu1 %165  ;;  %592 = vmatprep.subr.bf16.mxu1 %v655_v52  ;;  %600 = vmatprep.mubr.msk.bf16.mxu1 %vm656_vm15, %v655_v52 }
 0x17b   :  { %v249_v14 = vrot.slane %v248_v6, 4  ;;  %v179_v15 = vadd.f32 %v166_v13, %v760_v48  ;;  %v191_v20 = vrot.slane %v190_v5, 2  ;;  %v257_v48 = vsel %vm245_vm10, %v240_v17, -inf  ;;  %593 = vmatpush3.bf16.msra.mxu1 %v622_v46 }
 0x17c   :  { %v309_v16 = vsel %vm307_vm8, %v302_v10, -inf  ;;  %v411_v18 = vadd.f32 %v401_v31, %v384_v11  ;;  %594 = vmatprep.subr.bf16.mxu1 %v655_v52 }
 0x17d   :  { %v196_v21 = vsel %vm183_vm9, %v179_v15, -inf  ;;  %v224_v22 = vpop.permute.xlu0 %223  ;;  %v313_v23 = vmax.f32 %v312_v60, %v309_v16  ;;  %v250_v24 = vmax.f32 %v248_v6, %v249_v14  ;;  %v192_v38 = vmax.f32 %v190_v5, %v191_v20 }
 0x17e   :  { %v416_v25 = vsel %vm414_vm13, %v411_v18, -inf  ;;  %v199_v26 = vmax.f32 %v198_v62, %v196_v21  ;;  %v238_v27 = vadd.f32 %v224_v22, %v178_v44  ;;  %v226_v28 = vpop.permute.xlu1 %225 }
 0x17f   :  { %v417_v29 = vmax.f32 %v415_v19, %v416_v25  ;;  %v239_v32 = vadd.f32 %v226_v28, %v179_v15  ;;  %v251_v40 = vrot.slane %v250_v24, 2  ;;  %v193_v30 = vrot.slane %v192_v38, 1 }
 0x180   :  { %v200_v33 = vrot.slane %v199_v26, 4  ;;  %v255_v31 = vsel %vm241_vm7, %v238_v27, -inf  ;;  %v314_v37 = vrot.slane %v313_v23, 4 }
 0x181   :  { %v258_v34 = vmax.f32 %v255_v31, %v257_v48  ;;  %v256_v35 = vsel %vm243_vm12, %v239_v32, -inf  ;;  %v346_v36 = vpop.permute.xlu0 %345  ;;  %v252_v47 = vmax.f32 %v250_v24, %v251_v40  ;;  %v194_v60 = vmax.f32 %v192_v38, %v193_v30 }
 0x182   :  { %v201_v41 = vmax.f32 %v199_v26, %v200_v33  ;;  %v294_v42 = vpop.permute.xlu1 %293  ;;  %v355_v56 = vadd.f32 %v346_v36, %v748_v39  ;;  %v418_v6 = vrot.slane %v417_v29, 4  ;;  %v315_v7 = vmax.f32 %v313_v23, %v314_v37  ;;  %v623_v26 = vld [vmem:[%s892_s3 + $0x8] sm:$0xff]  }
 0x183   :  { %v259_v43 = vmax.f32 %v258_v34, %v256_v35  ;;  %v306_v55 = vadd.f32 %v294_v42, %v240_v17  ;;  %v253_v12 = vrot.slane %v252_v47, 1  ;;  %595 = vmatpush3.bf16.msra.mxu1 %v623_v26  ;;  %v624_v35 = vld [vmem:[%s892_s3 + $0x10] sm:$0xff]  }
 0x184   :  { %v202_v8 = vrot.slane %v201_v41, 2  ;;  %v419_v21 = vmax.f32 %v417_v29, %v418_v6  ;;  %v316_v24 = vrot.slane %v315_v7, 2  ;;  %596 = vmatprep.subr.bf16.mxu1 %v655_v52 }
 0x185   :  { %v260_v45 = vrot.slane %v259_v43, 4  ;;  %v372_v44 = vpop.permute.xlu0 %371  ;;  %v322_v63 = vsel %vm310_vm11, %v306_v55, -inf  ;;  %v254_v13 = vmax.f32 %v252_v47, %v253_v12 }
 0x186   :  { %v203_v49 = vmax.f32 %v201_v41, %v202_v8  ;;  %v348_v50 = vpop.permute.xlu1 %347  ;;  %v381_v2 = vadd.f32 %v372_v44, %v355_v56  ;;  %v317_v33 = vmax.f32 %v315_v7, %v316_v24  ;;  %v420_v31 = vrot.slane %v419_v21, 2  ;;  %v625_v8 = vld [vmem:[%s892_s3 + $0x18] sm:$0xff]   ;;  %v581_v56 = vld [vmem:[%s893_s4] ss:$0 sm:$0xff] }
 0x187   :  { %v261_v51 = vmax.f32 %v259_v43, %v260_v45  ;;  %v356_v3 = vadd.f32 %v348_v50, %v766_v53  ;;  %597 = vmatpush3.bf16.msra.mxu1 %v624_v35 }
 0x188   :  { %v204_v54 = vrot.slane %v203_v49, 1  ;;  %v318_v38 = vrot.slane %v317_v33, 1  ;;  %v421_v41 = vmax.f32 %v419_v21, %v420_v31  ;;  %598 = vmatprep.subr.bf16.mxu1 %v655_v52  ;;  %v580_v52 = vld [vmem:[%s891_s2] ss:$0 sm:$0xff]  ;;  %s626_s2 = scalar_lea.vmem %s563_s22, 32 }
 0x189   :  { %v262_v57 = vrot.slane %v261_v51, 2  ;;  %v290_v58 = vpop.permute.xlu0 %289  ;;  %p627_p0 = scmp.ne.s32.totalorder %s563_s22, %s626_s2  ;;  %p632_p2 = scmp.lt.s32.totalorder %s626_s2, %s626_s2 }
 0x18a   :  { %v304_v9 = vadd.f32 %v290_v58, %v238_v27  ;;  %v374_v59 = vpop.permute.xlu1 %373  ;;  %v205_v61 = vmax.f32 %v203_v49, %v204_v54  ;;  %v385_v14 = vadd.f32 %v381_v2, %v290_v58  ;;  %v319_v44 = vmax.f32 %v317_v33, %v318_v38 }
 0x18b   :  { %v263_v62 = vmax.f32 %v261_v51, %v262_v57  ;;  %v382_v15 = vadd.f32 %v374_v59, %v356_v3  ;;  %v422_v30 = vrot.slane %v421_v41, 1  ;;  %599 = vmatpush3.bf16.msra.mxu1 %v625_v8  ;;  %p633_p3 = por %p632_p2, %p631_p1 }
 0x18c   :  { %v320_v0 = vsel %vm307_vm8, %v304_v9, -inf  ;;  %v845_v1 = vsel %vm435_vm14, %v205_v61, %v194_v60 }
 0x18d   :  { %v323_v4 = vmax.f32 %v320_v0, %v322_v63  ;;  %v264_v5 = vrot.slane %v263_v62, 1  ;;  %v403_v10 = vpop.permute.xlu0 %402  ;;  %v423_v50 = vmax.f32 %v421_v41, %v422_v30  ;;  %p634_p4 = pnand %p633_p3, %p627_p0 }
 0x18e   :  { %v292_v11 = vpop.permute.xlu1 %291  ;;  %v412_v16 = vadd.f32 %v403_v10, %v385_v14 }
 0x18f   :  { %v305_v39 = vadd.f32 %v292_v11, %v239_v32  ;;  %v265_v17 = vmax.f32 %v263_v62, %v264_v5  ;;  %v386_v19 = vadd.f32 %v382_v15, %v292_v11 }
 0x190   :  { %v424_v27 = vsel %vm414_vm13, %v412_v16, -inf }
 0x191   :  { %v321_v18 = vsel %vm307_vm8, %v305_v39, -inf  ;;  %v440_v20 = vsel %vm435_vm14, %v265_v17, %v254_v13 }
 0x192   :  { %v324_v22 = vmax.f32 %v323_v4, %v321_v18  ;;  %441 = vrot.lane.b32.xlu0 %v440_v20, %s651_s0  ;;  %v405_v53 = vpop.permute.xlu1 %404 }
 0x193   :  { %v413_v23 = vadd.f32 %v405_v53, %v386_v19 }
 0x194   :  { %v325_v25 = vrot.slane %v324_v22, 4 }
 0x195   :  { %v425_v28 = vsel %vm414_vm13, %v413_v23, -inf }
 0x196   :  { %v326_v32 = vmax.f32 %v324_v22, %v325_v25  ;;  %v426_v48 = vmax.f32 %v424_v27, %v425_v28 }
 0x198   :  { %v327_v29 = vrot.slane %v326_v32, 2  ;;  %v427_v34 = vrot.slane %v426_v48, 4 }
 0x19a   :  { %v428_v36 = vmax.f32 %v426_v48, %v427_v34  ;;  %v328_v40 = vmax.f32 %v326_v32, %v327_v29 }
 0x19c   :  { %v429_v42 = vrot.slane %v428_v36, 2  ;;  %v329_v43 = vrot.slane %v328_v40, 1 }
 0x19e   :  { %v430_v45 = vmax.f32 %v428_v36, %v429_v42  ;;  %v330_v46 = vmax.f32 %v328_v40, %v329_v43 }
 0x1a0   :  { %v446_v47 = vsel %vm435_vm14, %v330_v46, %v319_v44  ;;  %v431_v49 = vrot.slane %v430_v45, 1 }
 0x1a1   :  { %447 = vrot.lane.b32.xlu1 %v446_v47, %s653_s7 }
 0x1a2   :  { %v432_v51 = vmax.f32 %v430_v45, %v431_v49 }
 0x1a4   :  { %v452_v54 = vsel %vm435_vm14, %v432_v51, %v423_v50 }
 0x1a5   :  { %453 = vrot.lane.b32.xlu0 %v452_v54, %s657_s17 }
 0x204   :  { %v442_v55 = vpop.permute.xlu0 %441 }
 0x205   :  { %v456_v37 = vsel %vm183_vm9, %v845_v1, %v442_v55 }
 0x213   :  { %v448_v57 = vpop.permute.xlu1 %447 }
 0x214   :  { %v457_v58 = vsel %vm67_vm0, %v456_v37, %v448_v57 }
 0x217   :  { %v454_v9 = vpop.permute.xlu0 %453 }
 0x218   :  { %v459_v59 = vsel %vm458_vm1, %v457_v58, %v454_v9 }
 0x219   :  { %v467_v12 = vadd.f32 %v580_v52, %v459_v59 }
 0x21b   :  { %vm468_vm2 = vcmp.ge.f32.partialorder %v467_v12, 0.0  ;;  %v469_v60 = vmul.f32 0.01, %v467_v12 }
 0x21d   :  { %v470_v61 = vsel %vm468_vm2, %v467_v12, %v469_v60 }
 0x21e   :  { %v471_v62 = vpack.c.bf16 %v470_v61, %v470_v61 }
 0x220   :  { %601 = vmatmul.mubr.msk.bf16.vlgmr.msra.gmra.mrb[0].mxu1 %vm511_vm3, %v471_v62 }
 0x2f3   :  { %v549_v63 = vpop.f32.mrb[0].mxu1 }
 0x2f4   :  { %v550_v0 = vadd.f32 %v581_v56, %v549_v63  ;;  %v602_v1 = vpop.f32.mrb[1].mxu1 }
 0x2f5   :  { %v552_v2 = vpop.f32.mrb[2].mxu1 }
 0x2f6   :  { %555 = vst [vmem:[#allocation2] sm:$0x3] %v550_v0  ;;  %v603_v3 = vpop.f32.mrb[3].mxu1 }
 0x2f7   :  { %637 = shalt.err (!%p634_p4)
}
 0x2f8   :  { %s638_s4 = scalar_lea.hbm %s894_s5, 32 }
 0x2f9   :  { %p639_p5 = scmp.ne.s32.totalorder %s894_s5, %s638_s4  ;;  %p642_p6 = scmp.lt.u32.totalorder %s638_s4, %s894_s5 }
 0x2fb   :  { %p644_p7 = pnand %p642_p6, %p639_p5 }
 0x2fd   :  { %647 = shalt.err (!%p644_p7)
}
 0x2fe   :  { %565 = dma.vmem_to_hbm [thread:$0]  %s563_s22, 32, %s894_s5, [#allocation3]  }
 0x2ff   :  { %648 = dma.done.wait [#allocation3], 32  }
 0x300   :  { %649 = vsyncadd [#allocation3], 4294967264 }
 0x301   :  { %569 = vsyncpa [#allocation3], 1 }

</bundles_post_ra>
